<compile_context>
chip_gen: v7x
topology: tpu7x:2x2x1
jax: 0.10.0
libtpu: 0.0.40
codegen_flags: <defaults>
</compile_context>

<pallas_src>
import functools

import jax
import jax.numpy as jnp
from jax.experimental import pallas as pl
from jax.experimental.pallas import tpu as pltpu


def _round_up(x: int, m: int) -> int:
    return ((x + m - 1) // m) * m


def ddpg_critic_kernel(x_ref, win_ref, wh_ref, wout_ref, b_ref, out_ref,
                       *, h1p: int, h2p: int, mxu_dtype):
    # Biases live in one lane-aligned f32 buffer: [b1 | b2 | b3(padded)].
    b1 = b_ref[:, :h1p]
    b2 = b_ref[:, h1p:h1p + h2p]
    b3 = b_ref[:, h1p + h2p:]

    # Fused layer-1 + action-contribution dot with the block-diagonal weight:
    #   X = [obs | act]  ->  t = [obs @ W1 | act @ W2_act]   (f32 accumulate)
    t = jnp.dot(x_ref[...], win_ref[...], preferred_element_type=jnp.float32)

    h = jnp.maximum(t[:, :h1p] + b1, 0.0)      # layer-1 activations (TB, h1p)
    act_contrib = t[:, h1p:]                   # act @ W2[h1:]       (TB, h2p)

    # Layer 2: relu(h @ W2[:h1] + act_contrib + b2), single K=h1p dot.
    z = jnp.dot(h.astype(mxu_dtype), wh_ref[...],
                preferred_element_type=jnp.float32) + act_contrib
    z = jnp.maximum(z + b2, 0.0)

    # Output layer into a narrow (TB, 8) slab; only column 0 is valid.
    out_ref[...] = jnp.dot(z.astype(mxu_dtype), wout_ref[...],
                           preferred_element_type=jnp.float32) + b3


def pack_params(params, obs_size: int, act_size: int, *,
                mxu_dtype=jnp.float32, out_w: int = 8):
    """One-time (per parameter update) padding / fusing of the critic weights.

    Padding is mathematically exact (zero rows/cols, zero bias entries).
    Returns a dict of device arrays + static dims, reused by every forward.
    """
    w1, b1, w2, b2, w3, b3 = params
    h1 = w1.shape[1]
    h2 = w2.shape[1]
    assert w2.shape[0] == h1 + act_size
    assert w3.shape[1] == 1

    h1p = _round_up(h1, 128)
    h2p = _round_up(h2, 128)
    obsp = _round_up(obs_size, 8)
    actp = _round_up(act_size, 8)

    # Block-diagonal fused input weight:
    #   rows [0:obs]        -> W1          (columns [0:h1])
    #   rows [obsp:obsp+act]-> W2[h1:, :]  (columns [h1p:h1p+h2])
    w_in = jnp.zeros((obsp + actp, h1p + h2p), jnp.float32)
    w_in = w_in.at[:obs_size, :h1].set(w1)
    w_in = w_in.at[obsp:obsp + act_size, h1p:h1p + h2].set(w2[h1:, :])

    # Hidden-path half of layer 2, and the narrow output layer.
    w_h = jnp.zeros((h1p, h2p), jnp.float32).at[:h1, :h2].set(w2[:h1, :])
    w_out = jnp.zeros((h2p, out_w), jnp.float32).at[:h2, :1].set(w3)

    # All biases in one lane-contiguous f32 buffer.
    b_all = jnp.concatenate(
        [jnp.pad(b1, ((0, 0), (0, h1p - h1))),
         jnp.pad(b2, ((0, 0), (0, h2p - h2))),
         jnp.pad(b3, ((0, 0), (0, out_w - 1)))],
        axis=1)                                   # (1, h1p + h2p + out_w)

    return {
        "w_in": w_in.astype(mxu_dtype),
        "w_h": w_h.astype(mxu_dtype),
        "w_out": w_out.astype(mxu_dtype),
        "b_all": b_all,                           # biases stay f32
        "dims": (obs_size, act_size, obsp, actp, h1p, h2p, out_w),
    }


def ddpg_critic_forward(obs, action, packed, *, block_b: int = 1024):
    """obs: (B, obs_size) f32, action: (B, act_size) f32 -> (B, 1) f32."""
    obs_size, act_size, obsp, actp, h1p, h2p, out_w = packed["dims"]
    mxu_dtype = packed["w_in"].dtype
    B = obs.shape[0]
    assert obs.shape[1] == obs_size and action.shape[1] == act_size

    # Batch tile: multiple of 8 sublanes; few large tiles (single-TC chips),
    # >=2 tiles when B is large enough so v7x can split across TensorCores.
    tb = min(block_b, _round_up(B, 8))
    bpad = _round_up(B, tb)

    # Single fused activation slab [obs | 0 | act | 0], batch-padded.
    obs_p = jnp.pad(obs, ((0, bpad - B), (0, obsp - obs_size)))
    act_p = jnp.pad(action, ((0, bpad - B), (0, actp - act_size)))
    x = jnp.concatenate([obs_p, act_p], axis=1).astype(mxu_dtype)

    kernel = functools.partial(ddpg_critic_kernel,
                               h1p=h1p, h2p=h2p, mxu_dtype=mxu_dtype)

    out_padded = pl.pallas_call(
        kernel,
        out_shape=jax.ShapeDtypeStruct((bpad, out_w), jnp.float32),
        grid=(bpad // tb,),
        in_specs=[
            # batch-tiled fused activations
            pl.BlockSpec((tb, obsp + actp), lambda i: (i, 0)),
            # VMEM-resident parameters (constant index_map -> copied once)
            pl.BlockSpec((obsp + actp, h1p + h2p), lambda i: (0, 0)),
            pl.BlockSpec((h1p, h2p), lambda i: (0, 0)),
            pl.BlockSpec((h2p, out_w), lambda i: (0, 0)),
            pl.BlockSpec((1, h1p + h2p + out_w), lambda i: (0, 0)),
        ],
        out_specs=pl.BlockSpec((tb, out_w), lambda i: (i, 0)),
        compiler_params=pltpu.CompilerParams(
            dimension_semantics=("parallel",),
        ),
    )(x, packed["w_in"], packed["w_h"], packed["w_out"], packed["b_all"])

    return out_padded[:B, :1]


def make_params(key, obs_size, act_size, hidden1, hidden2):
    """Deterministic synthetic parameters (Kaiming-uniform-ish scaling)."""
    ks = jax.random.split(key, 6)

    def lin(kw, kb, fan_in, fan_out):
        bound = 1.0 / jnp.sqrt(fan_in)
        # stored transposed: (fan_in, fan_out)
        w = jax.random.uniform(kw, (fan_in, fan_out), jnp.float32, -bound, bound)
        b = jax.random.uniform(kb, (1, fan_out), jnp.float32, -bound, bound)
        return w, b

    w1, b1 = lin(ks[0], ks[1], obs_size, hidden1)
    w2, b2 = lin(ks[2], ks[3], hidden1 + act_size, hidden2)
    w3, b3 = lin(ks[4], ks[5], hidden2, 1)
    return (w1, b1, w2, b2, w3, b3)


def reference_forward(obs, action, params):
    w1, b1, w2, b2, w3, b3 = params
    x = jnp.maximum(obs @ w1 + b1, 0.0)
    x = jnp.maximum(jnp.concatenate([x, action], axis=1) @ w2 + b2, 0.0)
    return x @ w3 + b3


if __name__ == "__main__":
    # Module defaults hidden1 = hidden2 = 128; small, non-aligned obs/act dims
    # exercise the padding paths.
    B, OBS, ACT, H1, H2 = 64, 12, 5, 128, 128

    key = jax.random.PRNGKey(0)
    k_obs, k_act, k_par = jax.random.split(key, 3)

    obs = jax.random.normal(k_obs, (B, OBS), dtype=jnp.float32)
    action = jax.random.normal(k_act, (B, ACT), dtype=jnp.float32)
    params = make_params(k_par, OBS, ACT, H1, H2)
    ref = reference_forward(obs, action, params)

    # f32 MXU-operand path (exact, tight tolerance).
    packed_f32 = pack_params(params, OBS, ACT, mxu_dtype=jnp.float32)
    out = jax.block_until_ready(ddpg_critic_forward(obs, action, packed_f32))
    assert out.shape == (B, 1)
    assert jnp.allclose(out, ref, atol=2e-5, rtol=2e-5), "f32 mismatch vs reference"

    # bf16 MXU-operand path (native on v6e/v7x, f32 accumulation) — relaxed tol.
    packed_bf16 = pack_params(params, OBS, ACT, mxu_dtype=jnp.bfloat16)
    out_bf16 = jax.block_until_ready(ddpg_critic_forward(obs, action, packed_bf16))
    assert out_bf16.shape == (B, 1)
    assert jnp.allclose(out_bf16, ref, atol=5e-2, rtol=5e-2), "bf16 mismatch vs reference"

    print("KERNEL_OK")
</pallas_src>

<mosaic_0001>
module attributes {stable_mosaic.version = 11 : i64} {
  func.func @ddpg_critic_kernel(%arg0: i32, %arg1: memref<64x24xf32, #tpu.memory_space<vmem>>, %arg2: memref<24x256xf32, #tpu.memory_space<vmem>>, %arg3: memref<128x128xf32, #tpu.memory_space<vmem>>, %arg4: memref<128x8xf32, #tpu.memory_space<vmem>>, %arg5: memref<1x264xf32, #tpu.memory_space<vmem>>, %arg6: memref<64x8xf32, #tpu.memory_space<vmem>>) attributes {dimension_semantics = [#tpu.dimension_semantics<parallel>], iteration_bounds = array<i64: 1>, scalar_prefetch = 0 : i64, scratch_operands = 0 : i64, tpu.core_type = #tpu.core_type<tc>, window_params = [{transform_indices = @transform_0, window_bounds = array<i64: 64, 24>}, {pipeline_mode = #tpu.pipeline_mode<synchronous>, transform_indices = @transform_1, window_bounds = array<i64: 24, 256>}, {pipeline_mode = #tpu.pipeline_mode<synchronous>, transform_indices = @transform_2, window_bounds = array<i64: 128, 128>}, {pipeline_mode = #tpu.pipeline_mode<synchronous>, transform_indices = @transform_3, window_bounds = array<i64: 128, 8>}, {pipeline_mode = #tpu.pipeline_mode<synchronous>, transform_indices = @transform_4, window_bounds = array<i64: 1, 264>}, {transform_indices = @transform_5, window_bounds = array<i64: 64, 8>}]} {
    %c0 = arith.constant 0 : index
    %c0_0 = arith.constant 0 : index
    %0 = vector.load %arg5[%c0, %c0_0] : memref<1x264xf32, #tpu.memory_space<vmem>>, vector<1x128xf32>
    %c0_1 = arith.constant 0 : index
    %c128 = arith.constant 128 : index
    %1 = vector.load %arg5[%c0_1, %c128] : memref<1x264xf32, #tpu.memory_space<vmem>>, vector<1x128xf32>
    %c0_2 = arith.constant 0 : index
    %c256 = arith.constant 256 : index
    %2 = vector.load %arg5[%c0_2, %c256] : memref<1x264xf32, #tpu.memory_space<vmem>>, vector<1x8xf32>
    %c0_3 = arith.constant 0 : index
    %c0_4 = arith.constant 0 : index
    %3 = vector.load %arg1[%c0_3, %c0_4] : memref<64x24xf32, #tpu.memory_space<vmem>>, vector<64x24xf32>
    %c0_5 = arith.constant 0 : index
    %c0_6 = arith.constant 0 : index
    %4 = vector.load %arg2[%c0_5, %c0_6] : memref<24x256xf32, #tpu.memory_space<vmem>>, vector<24x256xf32>
    %cst = arith.constant dense<0.000000e+00> : vector<64x256xf32>
    %5 = tpu.matmul %3, %4, %cst {dimension_numbers = #tpu.dot_dimension_numbers<[1], [0], [0], [1], [0, 0, 1, 1], [], []>} : vector<64x24xf32>, vector<24x256xf32>, vector<64x256xf32> -> vector<64x256xf32>
    %6 = vector.extract_strided_slice %5 {offsets = [0, 0], sizes = [64, 128], strides = [1, 1]} : vector<64x256xf32> to vector<64x128xf32>
    %7 = vector.broadcast %0 : vector<1x128xf32> to vector<64x128xf32>
    %8 = arith.addf %6, %7 : vector<64x128xf32>
    %cst_7 = arith.constant 0.000000e+00 : f32
    %9 = vector.broadcast %cst_7 : f32 to vector<64x128xf32>
    %10 = arith.maximumf %8, %9 : vector<64x128xf32>
    %11 = vector.extract_strided_slice %5 {offsets = [0, 128], sizes = [64, 128], strides = [1, 1]} : vector<64x256xf32> to vector<64x128xf32>
    %c0_8 = arith.constant 0 : index
    %c0_9 = arith.constant 0 : index
    %12 = vector.load %arg3[%c0_8, %c0_9] : memref<128x128xf32, #tpu.memory_space<vmem>>, vector<128x128xf32>
    %cst_10 = arith.constant dense<0.000000e+00> : vector<64x128xf32>
    %13 = tpu.matmul %10, %12, %cst_10 {dimension_numbers = #tpu.dot_dimension_numbers<[1], [0], [0], [1], [0, 0, 1, 1], [], []>} : vector<64x128xf32>, vector<128x128xf32>, vector<64x128xf32> -> vector<64x128xf32>
    %14 = arith.addf %13, %11 : vector<64x128xf32>
    %15 = vector.broadcast %1 : vector<1x128xf32> to vector<64x128xf32>
    %16 = arith.addf %14, %15 : vector<64x128xf32>
    %cst_11 = arith.constant 0.000000e+00 : f32
    %17 = vector.broadcast %cst_11 : f32 to vector<64x128xf32>
    %18 = arith.maximumf %16, %17 : vector<64x128xf32>
    %c0_12 = arith.constant 0 : index
    %c0_13 = arith.constant 0 : index
    %19 = vector.load %arg4[%c0_12, %c0_13] : memref<128x8xf32, #tpu.memory_space<vmem>>, vector<128x8xf32>
    %cst_14 = arith.constant dense<0.000000e+00> : vector<64x8xf32>
    %20 = tpu.matmul %18, %19, %cst_14 {dimension_numbers = #tpu.dot_dimension_numbers<[1], [0], [0], [1], [0, 0, 1, 1], [], []>} : vector<64x128xf32>, vector<128x8xf32>, vector<64x8xf32> -> vector<64x8xf32>
    %21 = vector.broadcast %2 : vector<1x8xf32> to vector<64x8xf32>
    %22 = arith.addf %20, %21 : vector<64x8xf32>
    %c0_15 = arith.constant 0 : index
    %c0_16 = arith.constant 0 : index
    %23 = vector.load %arg6[%c0_15, %c0_16] : memref<64x8xf32, #tpu.memory_space<vmem>>, vector<64x8xf32>
    tpu.vector_store %arg6[%c0_15, %c0_16], %22 {strides = array<i32>} : memref<64x8xf32, #tpu.memory_space<vmem>>, vector<64x8xf32>,
    return
  }
  func.func @transform_0(%arg0: i32) -> (i32, i32) {
    %c0_i32 = arith.constant 0 : i32
    %c0_i32_0 = arith.constant 0 : i32
    return %arg0, %c0_i32 : i32, i32
  }
  func.func @transform_1(%arg0: i32) -> (i32, i32) {
    %c0_i32 = arith.constant 0 : i32
    %c0_i32_0 = arith.constant 0 : i32
    %c0_i32_1 = arith.constant 0 : i32
    return %c0_i32, %c0_i32_0 : i32, i32
  }
  func.func @transform_2(%arg0: i32) -> (i32, i32) {
    %c0_i32 = arith.constant 0 : i32
    %c0_i32_0 = arith.constant 0 : i32
    %c0_i32_1 = arith.constant 0 : i32
    return %c0_i32, %c0_i32_0 : i32, i32
  }
  func.func @transform_3(%arg0: i32) -> (i32, i32) {
    %c0_i32 = arith.constant 0 : i32
    %c0_i32_0 = arith.constant 0 : i32
    %c0_i32_1 = arith.constant 0 : i32
    return %c0_i32, %c0_i32_0 : i32, i32
  }
  func.func @transform_4(%arg0: i32) -> (i32, i32) {
    %c0_i32 = arith.constant 0 : i32
    %c0_i32_0 = arith.constant 0 : i32
    %c0_i32_1 = arith.constant 0 : i32
    return %c0_i32, %c0_i32_0 : i32, i32
  }
  func.func @transform_5(%arg0: i32) -> (i32, i32) {
    %c0_i32 = arith.constant 0 : i32
    %c0_i32_0 = arith.constant 0 : i32
    return %arg0, %c0_i32 : i32, i32
  }
}

</mosaic_0001>

<bundles_post_ra>
// kernel: tpu_custom_call.1
= control target key start
LH: loop header
LB: loop body
LE: loop exit
PB: predicated region body
PF: predicated region fallthrough
CT: control target
= control target key end

     0   :  { %v696_v3 = vmov 0.0   ;;  %vm37_vm0 = vcmask 195584   ;;  %vm467_vm1 = vcmask 64512   ;;  %s922_s1 = inlined_call_operand.vmem [shape: f32[24,256], index: 1, kind: input, shape index: {}]   ;;  %s923_s2 = inlined_call_operand.vmem [shape: f32[128,128], index: 2, kind: input, shape index: {}]   ;;  %s924_s0 = inlined_call_operand.vmem [shape: f32[64,24], index: 0, kind: input, shape index: {}]   ;;  %s925_s3 = inlined_call_operand.vmem [shape: f32[128,8], index: 3, kind: input, shape index: {}]   ;;  %s926_s4 = inlined_call_operand.vmem [shape: f32[1,264], index: 4, kind: input, shape index: {}]   ;;  %s927_s5 = inlined_call_operand.vmem [shape: f32[64,8], index: 5, kind: output, shape index: {}]  }
   0x1   :  { %v32_v0 = vld [vmem:[%s922_s1 + $0x8] sm:$0xff]  ;;  %v34_v1 = vld [vmem:[%s922_s1 + $0x18] sm:$0xff]  ;;  %v31_v2 = vld [vmem:[%s922_s1] sm:$0xff]  ;;  %126 = vmatprep.mubr.f32.mxu0 %v696_v3 }
   0x2   :  { %v627_v4 = vpack.c.bf16 %v34_v1, %v32_v0  ;;  %v33_v5 = vld [vmem:[%s922_s1 + $0x10] sm:$0xff]  ;;  %v36_v7 = vld [vmem:[%s922_s1 + $0x28] sm:$0xff]  ;;  %v35_v8 = vld [vmem:[%s922_s1 + $0x20] sm:$0xff] }
   0x3   :  { %v629_v6 = vpack.c.bf16 %v33_v5, %v31_v2  ;;  %v197_v9 = vld [vmem:[%s923_s2] sm:$0xff]  ;;  %v198_v10 = vld [vmem:[%s923_s2 + $0x8] sm:$0xff]  ;;  %v199_v11 = vld [vmem:[%s923_s2 + $0x10] sm:$0xff] }
   0x4   :  { %628 = vmatprep.subr.bf16.mxu0 %v627_v4  ;;  %v200_v12 = vld [vmem:[%s923_s2 + $0x18] sm:$0xff]  ;;  %v23_v13 = vld [vmem:[%s924_s0] sm:$0xff]  ;;  %v631_v14 = vpack.c.bf16 %v198_v10, %v197_v9  ;;  %v202_v17 = vld [vmem:[%s923_s2 + $0x28] sm:$0xff] }
   0x5   :  { %630 = vmatpush1.bf16.msra.mxu0 %v629_v6  ;;  %v635_v15 = vpack.c.bf16 %v200_v12, %v199_v11  ;;  %v201_v16 = vld [vmem:[%s923_s2 + $0x20] sm:$0xff]  ;;  %v24_v18 = vld [vmem:[%s924_s0 + $0x8] sm:$0xff]  ;;  %v203_v20 = vld [vmem:[%s923_s2 + $0x30] sm:$0xff] }
   0x6   :  { %66 = vmatprep.subr.mxu0 %v36_v7  ;;  %632 = vmatprep.subr.bf16.mxu1 %v631_v14  ;;  %v639_v19 = vpack.c.bf16 %v202_v17, %v201_v16  ;;  %v204_v21 = vld [vmem:[%s923_s2 + $0x38] sm:$0xff]  ;;  %v25_v22 = vld [vmem:[%s924_s0 + $0x10] sm:$0xff]  ;;  %v205_v24 = vld [vmem:[%s923_s2 + $0x40] sm:$0xff] }
   0x7   :  { %634 = vmatpush3.bf16.msra.mxu1 %v631_v14  ;;  %v643_v23 = vpack.c.bf16 %v204_v21, %v203_v20  ;;  %v206_v25 = vld [vmem:[%s923_s2 + $0x48] sm:$0xff]  ;;  %v26_v26 = vld [vmem:[%s924_s0 + $0x18] sm:$0xff]  ;;  %v207_v28 = vld [vmem:[%s923_s2 + $0x50] sm:$0xff] }
   0x8   :  { %636 = vmatprep.subr.bf16.mxu1 %v635_v15  ;;  %v647_v27 = vpack.c.bf16 %v206_v25, %v205_v24  ;;  %v208_v29 = vld [vmem:[%s923_s2 + $0x58] sm:$0xff]  ;;  %v27_v30 = vld [vmem:[%s924_s0 + $0x20] sm:$0xff]  ;;  %v28_v32 = vld [vmem:[%s924_s0 + $0x28] sm:$0xff] }
   0x9   :  { %67 = vmatpush1.msra.mxu0 %v35_v8  ;;  %v651_v31 = vpack.c.bf16 %v208_v29, %v207_v28  ;;  %v29_v33 = vld [vmem:[%s924_s0 + $0x30] sm:$0xff]  ;;  %v30_v34 = vld [vmem:[%s924_s0 + $0x38] sm:$0xff]  ;;  %v209_v35 = vld [vmem:[%s923_s2 + $0x60] sm:$0xff] }
   0xa   :  { %480 = vmatmul.mubr.msk.f32.vlgmr.msra.gmra.mrb[0].mxu0 %vm37_vm0, %v23_v13  ;;  %v210_v36 = vld [vmem:[%s923_s2 + $0x68] sm:$0xff]  ;;  %v211_v38 = vld [vmem:[%s923_s2 + $0x70] sm:$0xff]  ;;  %v212_v39 = vld [vmem:[%s923_s2 + $0x78] sm:$0xff] }
   0xb   :  { %132 = vmatprep.mubr.f32.mxu0 %v696_v3  ;;  %638 = vmatpush3.bf16.msra.mxu1 %v635_v15  ;;  %v655_v37 = vpack.c.bf16 %v210_v36, %v209_v35  ;;  %v659_v40 = vpack.c.bf16 %v212_v39, %v211_v38  ;;  %v340_v41 = vld [vmem:[%s925_s3] sm:$0xff]  ;;  %v341_v42 = vld [vmem:[%s925_s3 + $0x8] sm:$0xff]  ;;  %v342_v43 = vld [vmem:[%s925_s3 + $0x10] sm:$0xff] }
   0xc   :  { %640 = vmatprep.subr.bf16.mxu1 %v639_v19  ;;  %v663_v44 = vpack.c.bf16 %v341_v42, %v340_v41  ;;  %v343_v45 = vld [vmem:[%s925_s3 + $0x18] sm:$0xff]  ;;  %v344_v47 = vld [vmem:[%s925_s3 + $0x20] sm:$0xff]  ;;  %v345_v48 = vld [vmem:[%s925_s3 + $0x28] sm:$0xff] }
   0xd   :  { %v667_v46 = vpack.c.bf16 %v343_v45, %v342_v43  ;;  %v671_v49 = vpack.c.bf16 %v345_v48, %v344_v47  ;;  %v346_v50 = vld [vmem:[%s925_s3 + $0x30] sm:$0xff]  ;;  %v347_v51 = vld [vmem:[%s925_s3 + $0x38] sm:$0xff]  ;;  %v348_v53 = vld [vmem:[%s925_s3 + $0x40] sm:$0xff] }
   0xe   :  { %481 = vmatmul.mubr.msk.f32.gmra.mrb[2].mxu0 %vm37_vm0, %v24_v18  ;;  %664 = vmatprep.subr.bf16.mxu0 %v663_v44  ;;  %v675_v52 = vpack.c.bf16 %v347_v51, %v346_v50  ;;  %v349_v54 = vld [vmem:[%s925_s3 + $0x48] sm:$0xff]  ;;  %v350_v56 = vld [vmem:[%s925_s3 + $0x50] sm:$0xff]  ;;  %v351_v57 = vld [vmem:[%s925_s3 + $0x58] sm:$0xff] }
   0xf   :  { %138 = vmatprep.mubr.f32.mxu0 %v696_v3  ;;  %642 = vmatpush3.bf16.msra.mxu1 %v639_v19  ;;  %v679_v55 = vpack.c.bf16 %v349_v54, %v348_v53  ;;  %v683_v58 = vpack.c.bf16 %v351_v57, %v350_v56  ;;  %v488_v59 = vld [vmem:[%s926_s4] ss:$0 sm:$0xff]  ;;  %v353_v29 = vld [vmem:[%s925_s3 + $0x68] sm:$0xff] }
  0x10   :  { %644 = vmatprep.subr.bf16.mxu1 %v643_v23  ;;  %666 = vmatpush3.bf16.msra.mxu0 %v663_v44  ;;  %v352_v28 = vld [vmem:[%s925_s3 + $0x60] sm:$0xff] }
  0x11   :  { %668 = vmatprep.subr.bf16.mxu0 %v667_v46 }
  0x12   :  { %482 = vmatmul.mubr.msk.f32.gmra.mrb[4].mxu0 %vm37_vm0, %v25_v22 }
  0x13   :  { %144 = vmatprep.mubr.f32.mxu0 %v696_v3  ;;  %646 = vmatpush3.bf16.msra.mxu1 %v643_v23 }
  0x14   :  { %648 = vmatprep.subr.bf16.mxu1 %v647_v27  ;;  %670 = vmatpush3.bf16.msra.mxu0 %v667_v46 }
  0x15   :  { %672 = vmatprep.subr.bf16.mxu0 %v671_v49 }
  0x16   :  { %483 = vmatmul.mubr.msk.f32.gmra.mrb[6].mxu0 %vm37_vm0, %v26_v26 }
  0x17   :  { %150 = vmatprep.mubr.f32.mxu0 %v696_v3  ;;  %650 = vmatpush3.bf16.msra.mxu1 %v647_v27 }
  0x18   :  { %652 = vmatprep.subr.bf16.mxu1 %v651_v31  ;;  %674 = vmatpush3.bf16.msra.mxu0 %v671_v49 }
  0x19   :  { %676 = vmatprep.subr.bf16.mxu0 %v675_v52 }
  0x1a   :  { %484 = vmatmul.mubr.msk.f32.gmra.mrb[8].mxu0 %vm37_vm0, %v27_v30  ;;  %v687_v30 = vpack.c.bf16 %v353_v29, %v352_v28 }
  0x1b   :  { %156 = vmatprep.mubr.f32.mxu0 %v696_v3  ;;  %654 = vmatpush3.bf16.msra.mxu1 %v651_v31  ;;  %v354_v31 = vld [vmem:[%s925_s3 + $0x70] sm:$0xff] }
  0x1c   :  { %656 = vmatprep.subr.bf16.mxu1 %v655_v37  ;;  %678 = vmatpush3.bf16.msra.mxu0 %v675_v52 }
  0x1d   :  { %680 = vmatprep.subr.bf16.mxu0 %v679_v55 }
  0x1e   :  { %485 = vmatmul.mubr.msk.f32.gmra.mrb[10].mxu0 %vm37_vm0, %v28_v32  ;;  %v355_v32 = vld [vmem:[%s925_s3 + $0x78] sm:$0xff] }
  0x1f   :  { %162 = vmatprep.mubr.f32.mxu0 %v696_v3  ;;  %658 = vmatpush3.bf16.msra.mxu1 %v655_v37 }
  0x20   :  { %660 = vmatprep.subr.bf16.mxu1 %v659_v40  ;;  %682 = vmatpush3.bf16.msra.mxu0 %v679_v55 }
  0x21   :  { %684 = vmatprep.subr.bf16.mxu0 %v683_v58 }
  0x22   :  { %486 = vmatmul.mubr.msk.f32.gmra.mrb[12].mxu0 %vm37_vm0, %v29_v33  ;;  %v691_v33 = vpack.c.bf16 %v355_v32, %v354_v31 }
  0x23   :  { %168 = vmatprep.mubr.f32.mxu0 %v696_v3  ;;  %662 = vmatpush3.bf16.msra.mxu1 %v659_v40 }
  0x24   :  { %686 = vmatpush3.bf16.msra.mxu0 %v683_v58 }
  0x25   :  { %688 = vmatprep.subr.bf16.mxu0 %v687_v30 }
  0x26   :  { %487 = vmatmul.mubr.msk.f32.gmra.mrb[14].mxu0 %vm37_vm0, %v30_v34  ;;  %v489_v34 = vld [vmem:[%s926_s4 + $0x1] ss:$0 sm:$0xff] }
  0x28   :  { %690 = vmatpush3.bf16.msra.mxu0 %v687_v30 }
  0x29   :  { %692 = vmatprep.subr.bf16.mxu0 %v691_v33 }
  0x2c   :  { %694 = vmatpush3.bf16.msra.mxu0 %v691_v33 }
  0xdd   :  { %v128_v60 = vpop.f32.mrb[0].mxu0 }
  0xde   :  { %v130_v61 = vpop.f32.mrb[1].mxu0  ;;  %v181_v62 = vadd.f32 %v488_v59, %v128_v60 }
  0xe0   :  { %v189_v63 = vmax.f32 %v181_v62, 0.0 }
  0xe1   :  { %v134_v0 = vpop.f32.mrb[2].mxu0 }
  0xe2   :  { %v182_v1 = vadd.f32 %v488_v59, %v134_v0  ;;  %v136_v2 = vpop.f32.mrb[3].mxu0  ;;  %571 = vmatprep.mubr.f32.mxu1 %v189_v63 }
  0xe4   :  { %v190_v3 = vmax.f32 %v182_v1, 0.0 }
  0xe5   :  { %v140_v4 = vpop.f32.mrb[4].mxu0 }
  0xe6   :  { %v183_v5 = vadd.f32 %v488_v59, %v140_v4  ;;  %v142_v6 = vpop.f32.mrb[5].mxu0  ;;  %572 = vmatmul.mubr.f32.vlgmr.msra.gmra.mrb[0].mxu1 %v190_v3  ;;  %v490_v3 = vld [vmem:[%s926_s4 + $0x2] ss:$0 sm:$0xff] }
  0xe8   :  { %v191_v7 = vmax.f32 %v183_v5, 0.0 }
  0xe9   :  { %v146_v8 = vpop.f32.mrb[6].mxu0 }
  0xea   :  { %v184_v9 = vadd.f32 %v488_v59, %v146_v8  ;;  %v148_v10 = vpop.f32.mrb[7].mxu0  ;;  %574 = vmatprep.mubr.f32.mxu1 %v191_v7 }
  0xec   :  { %v192_v11 = vmax.f32 %v184_v9, 0.0 }
  0xed   :  { %v152_v12 = vpop.f32.mrb[8].mxu0 }
  0xee   :  { %v185_v13 = vadd.f32 %v488_v59, %v152_v12  ;;  %v154_v14 = vpop.f32.mrb[9].mxu0  ;;  %575 = vmatmul.mubr.f32.gmra.mrb[2].mxu1 %v192_v11 }
  0xf0   :  { %v193_v15 = vmax.f32 %v185_v13, 0.0 }
  0xf1   :  { %v158_v16 = vpop.f32.mrb[10].mxu0 }
  0xf2   :  { %v186_v17 = vadd.f32 %v488_v59, %v158_v16  ;;  %v160_v18 = vpop.f32.mrb[11].mxu0  ;;  %577 = vmatprep.mubr.f32.mxu1 %v193_v15 }
  0xf4   :  { %v194_v19 = vmax.f32 %v186_v17, 0.0 }
  0xf5   :  { %v164_v20 = vpop.f32.mrb[12].mxu0 }
  0xf6   :  { %v187_v21 = vadd.f32 %v488_v59, %v164_v20  ;;  %v166_v22 = vpop.f32.mrb[13].mxu0  ;;  %578 = vmatmul.mubr.f32.gmra.mrb[4].mxu1 %v194_v19 }
  0xf8   :  { %v195_v23 = vmax.f32 %v187_v21, 0.0 }
  0xf9   :  { %v170_v24 = vpop.f32.mrb[14].mxu0 }
  0xfa   :  { %v188_v25 = vadd.f32 %v488_v59, %v170_v24  ;;  %v172_v26 = vpop.f32.mrb[15].mxu0  ;;  %580 = vmatprep.mubr.f32.mxu1 %v195_v23 }
  0xfc   :  { %v196_v27 = vmax.f32 %v188_v25, 0.0 }
  0xfe   :  { %581 = vmatmul.mubr.f32.gmra.mrb[6].mxu1 %v196_v27 }
 0x1b9   :  { %v573_v35 = vpop.f32.mrb[0].mxu1 }
 0x1ba   :  { %v285_v36 = vadd.f32 %v573_v35, %v136_v2  ;;  %v279_v37 = vpop.f32.mrb[1].mxu1 }
 0x1bb   :  { %v280_v38 = vadd.f32 %v279_v37, %v130_v61 }
 0x1bc   :  { %v325_v39 = vadd.f32 %v489_v34, %v285_v36 }
 0x1bd   :  { %v324_v40 = vadd.f32 %v489_v34, %v280_v38 }
 0x1be   :  { %v333_v42 = vmax.f32 %v325_v39, 0.0 }
 0x1bf   :  { %v332_v41 = vmax.f32 %v324_v40, 0.0 }
 0x1c1   :  { %v576_v43 = vpop.f32.mrb[2].mxu1  ;;  %615 = vmatprep.mubr.f32.mxu0 %v332_v41 }
 0x1c2   :  { %v295_v44 = vadd.f32 %v576_v43, %v148_v10  ;;  %v289_v45 = vpop.f32.mrb[3].mxu1  ;;  %616 = vmatmul.mubr.f32.vlgmr.msra.gmra.mrb[16].mxu0 %v333_v42 }
 0x1c3   :  { %v290_v46 = vadd.f32 %v289_v45, %v142_v6 }
 0x1c4   :  { %v327_v47 = vadd.f32 %v489_v34, %v295_v44 }
 0x1c5   :  { %v326_v48 = vadd.f32 %v489_v34, %v290_v46 }
 0x1c6   :  { %v335_v50 = vmax.f32 %v327_v47, 0.0 }
 0x1c7   :  { %v334_v49 = vmax.f32 %v326_v48, 0.0 }
 0x1c9   :  { %v579_v51 = vpop.f32.mrb[4].mxu1  ;;  %618 = vmatprep.mubr.f32.mxu0 %v334_v49 }
 0x1ca   :  { %v305_v52 = vadd.f32 %v579_v51, %v160_v18  ;;  %v299_v53 = vpop.f32.mrb[5].mxu1  ;;  %619 = vmatmul.mubr.f32.gmra.mrb[18].mxu0 %v335_v50 }
 0x1cb   :  { %v300_v54 = vadd.f32 %v299_v53, %v154_v14 }
 0x1cc   :  { %v329_v55 = vadd.f32 %v489_v34, %v305_v52 }
 0x1cd   :  { %v328_v56 = vadd.f32 %v489_v34, %v300_v54 }
 0x1ce   :  { %v337_v58 = vmax.f32 %v329_v55, 0.0 }
 0x1cf   :  { %v336_v57 = vmax.f32 %v328_v56, 0.0 }
 0x1d1   :  { %v582_v59 = vpop.f32.mrb[6].mxu1  ;;  %621 = vmatprep.mubr.f32.mxu0 %v336_v57 }
 0x1d2   :  { %v315_v60 = vadd.f32 %v582_v59, %v172_v26  ;;  %v309_v61 = vpop.f32.mrb[7].mxu1  ;;  %622 = vmatmul.mubr.f32.gmra.mrb[20].mxu0 %v337_v58 }
 0x1d3   :  { %v310_v62 = vadd.f32 %v309_v61, %v166_v22 }
 0x1d4   :  { %v331_v63 = vadd.f32 %v489_v34, %v315_v60 }
 0x1d5   :  { %v330_v0 = vadd.f32 %v489_v34, %v310_v62 }
 0x1d6   :  { %v339_v2 = vmax.f32 %v331_v63, 0.0 }
 0x1d7   :  { %v338_v1 = vmax.f32 %v330_v0, 0.0 }
 0x1d9   :  { %624 = vmatprep.mubr.f32.mxu0 %v338_v1 }
 0x1da   :  { %625 = vmatmul.mubr.f32.gmra.mrb[22].mxu0 %v339_v2 }
 0x295   :  { %v617_v4 = vpop.f32.mrb[16].mxu0 }
 0x296   :  { %v434_v5 = vadd.f32 %v617_v4, %v490_v3  ;;  %v428_v6 = vpop.f32.mrb[17].mxu0 }
 0x297   :  { %v429_v7 = vadd.f32 %v490_v3, %v428_v6 }
 0x298   :  { %469 = vst.msk [vmem:[%s927_s5 + $0x8] sm:$0xff] %vm467_vm1, %v434_v5 }
 0x299   :  { %468 = vst.msk [vmem:[%s927_s5] sm:$0xff] %vm467_vm1, %v429_v7 }
 0x29d   :  { %v620_v8 = vpop.f32.mrb[18].mxu0 }
 0x29e   :  { %v444_v9 = vadd.f32 %v620_v8, %v490_v3  ;;  %v438_v10 = vpop.f32.mrb[19].mxu0 }
 0x29f   :  { %v439_v11 = vadd.f32 %v490_v3, %v438_v10 }
 0x2a0   :  { %471 = vst.msk [vmem:[%s927_s5 + $0x18] sm:$0xff] %vm467_vm1, %v444_v9 }
 0x2a1   :  { %470 = vst.msk [vmem:[%s927_s5 + $0x10] sm:$0xff] %vm467_vm1, %v439_v11 }
 0x2a5   :  { %v623_v12 = vpop.f32.mrb[20].mxu0 }
 0x2a6   :  { %v454_v13 = vadd.f32 %v623_v12, %v490_v3  ;;  %v448_v14 = vpop.f32.mrb[21].mxu0 }
 0x2a7   :  { %v449_v15 = vadd.f32 %v490_v3, %v448_v14 }
 0x2a8   :  { %473 = vst.msk [vmem:[%s927_s5 + $0x28] sm:$0xff] %vm467_vm1, %v454_v13 }
 0x2a9   :  { %472 = vst.msk [vmem:[%s927_s5 + $0x20] sm:$0xff] %vm467_vm1, %v449_v15 }
 0x2ad   :  { %v626_v16 = vpop.f32.mrb[22].mxu0 }
 0x2ae   :  { %v464_v17 = vadd.f32 %v626_v16, %v490_v3  ;;  %v458_v18 = vpop.f32.mrb[23].mxu0 }
 0x2af   :  { %v459_v19 = vadd.f32 %v490_v3, %v458_v18 }
 0x2b0   :  { %475 = vst.msk [vmem:[%s927_s5 + $0x38] sm:$0xff] %vm467_vm1, %v464_v17 }
 0x2b1   :  { %474 = vst.msk [vmem:[%s927_s5 + $0x30] sm:$0xff] %vm467_vm1, %v459_v19 }

</bundles_post_ra>
